<compile_context>
chip_gen: v6e
topology: v6e:2x2x1
jax: 0.10.0
libtpu: 0.0.40
codegen_flags: <defaults>
</compile_context>

<pallas_src>
import functools

import jax
import jax.numpy as jnp
from jax.experimental import pallas as pl
from jax.experimental.pallas import tpu as pltpu


def _round_up(x: int, m: int) -> int:
    return ((x + m - 1) // m) * m


def _cluster_assign_kernel(x_ref, ct_ref, c2_ref, o_ref, *,
                           alpha: float, power: float, k_real: int):
    # x_ref : (TN, D)      tile of the batch
    # ct_ref: (D, K_pad)   pre-transposed cluster centers (zero-padded cols)
    # c2_ref: (1, K_pad)   precomputed ||c_k||^2 (zero-padded cols)
    # o_ref : (TN, K_pad)  lane-dense output tile
    x = x_ref[...].astype(jnp.float32)            # (TN, D)
    ct = ct_ref[...].astype(jnp.float32)          # (D, K_pad)
    c2 = c2_ref[...].astype(jnp.float32)          # (1, K_pad)

    # ||x - c||^2 = ||x||^2 + ||c||^2 - 2 x.c   (pairwise distances via MXU)
    x2 = jnp.sum(x * x, axis=1, keepdims=True)                    # (TN, 1)
    xc = jnp.dot(x, ct, preferred_element_type=jnp.float32)       # (TN, K_pad)
    norm_sq = jnp.maximum(x2 + c2 - 2.0 * xc, 0.0)                # (TN, K_pad)

    numerator = 1.0 / (1.0 + norm_sq * (1.0 / alpha))
    if power != 1.0:                              # static: skipped for alpha==1
        numerator = numerator ** power

    # Zero out the padded cluster columns so they don't contribute to the sum.
    k_pad = o_ref.shape[1]
    if k_real != k_pad:
        col = jax.lax.broadcasted_iota(jnp.int32, numerator.shape, 1)
        numerator = jnp.where(col < k_real, numerator, 0.0)

    denom = jnp.sum(numerator, axis=1, keepdims=True)             # (TN, 1)
    # exact reciprocal keeps the rows-sum-to-1 invariant at ~1e-6
    o_ref[...] = (numerator * pl.reciprocal(denom, approx=False)).astype(o_ref.dtype)


def _choose_tile_n(N: int, D: int, k_pad: int) -> int:
    """Largest row tile (<=1024) whose VMEM footprint fits the default scoped
    limit on every TPU generation (conservative 24 MiB budget)."""
    budget = 24 << 20
    resident = 2 * (D * k_pad + k_pad) * 4          # centers + c2 (dbl-buffered)
    per_row = (2 * D + 2 * k_pad + 4 * k_pad) * 4   # x dbl-buf + out dbl-buf + temps
    tile = min(1024, _round_up(N, 8))
    while tile > 8 and resident + tile * per_row > budget:
        tile //= 2
    return max(8, _round_up(tile, 8))


def cluster_assignment(batch: jax.Array,
                       cluster_centers: jax.Array,
                       alpha: float = 1.0,
                       *,
                       tile_n: int | None = None) -> jax.Array:
    """Pallas version of ClusterAssignment.forward.

    batch:            (N, D) float32
    cluster_centers:  (K, D) float32
    returns:          (N, K) float32 soft assignments (rows sum to 1)
    """
    N, D = batch.shape
    K, D2 = cluster_centers.shape
    assert D == D2, "embedding dims must match"

    k_pad = _round_up(K, 128)                       # lane-dense output columns
    if tile_n is None:
        tile_n = _choose_tile_n(N, D, k_pad)
    tile_n = max(8, _round_up(tile_n, 8))
    n_pad = _round_up(N, tile_n)

    # Wrapper-side layout plumbing (done once, not per grid step):
    x = batch.astype(jnp.float32)
    if n_pad != N:
        x = jnp.pad(x, ((0, n_pad - N), (0, 0)))
    c = cluster_centers.astype(jnp.float32)
    ct = jnp.zeros((D, k_pad), jnp.float32).at[:, :K].set(c.T)           # (D, K_pad)
    c2 = jnp.zeros((1, k_pad), jnp.float32).at[:, :K].set(
        jnp.sum(c * c, axis=1)[None, :])                                 # (1, K_pad)

    power = float(alpha + 1.0) / 2.0
    kernel = functools.partial(_cluster_assign_kernel,
                               alpha=float(alpha), power=power, k_real=K)

    out = pl.pallas_call(
        kernel,
        out_shape=jax.ShapeDtypeStruct((n_pad, k_pad), jnp.float32),
        grid_spec=pltpu.PrefetchScalarGridSpec(
            num_scalar_prefetch=0,
            grid=(n_pad // tile_n,),
            in_specs=[
                pl.BlockSpec((tile_n, D), lambda i: (i, 0)),   # batch tile
                pl.BlockSpec((D, k_pad), lambda i: (0, 0)),    # centers^T (resident)
                pl.BlockSpec((1, k_pad), lambda i: (0, 0)),    # ||c||^2  (resident)
            ],
            out_specs=pl.BlockSpec((tile_n, k_pad), lambda i: (i, 0)),
        ),
        compiler_params=pltpu.CompilerParams(
            dimension_semantics=("parallel",)),   # batch axis shards across TCs on v7x
    )(x, ct, c2)

    return out[:N, :K]


def _xavier_uniform(key, shape):
    # matches nn.init.xavier_uniform_ for a 2-D tensor [fan_out, fan_in]
    fan_out, fan_in = shape
    bound = (6.0 / (fan_in + fan_out)) ** 0.5
    return jax.random.uniform(key, shape, jnp.float32, minval=-bound, maxval=bound)


def _reference(batch, centers, alpha=1.0):
    # pure-JAX reference mirroring the PyTorch forward exactly
    norm_sq = jnp.sum((batch[:, None, :] - centers[None, :, :]) ** 2, axis=2)
    num = 1.0 / (1.0 + norm_sq / alpha)
    num = num ** (float(alpha + 1.0) / 2.0)
    return num / jnp.sum(num, axis=1, keepdims=True)


if __name__ == "__main__":
    key = jax.random.PRNGKey(0)
    k_batch, k_centers, k_batch2 = jax.random.split(key, 3)

    # Case 1: small shapes consistent with the module (N nodes, D-dim emb, K clusters).
    N, D, K = 16, 32, 4
    alpha = 1.0
    batch = jax.random.normal(k_batch, (N, D), dtype=jnp.float32)
    cluster_centers = _xavier_uniform(k_centers, (K, D))

    out = cluster_assignment(batch, cluster_centers, alpha=alpha)
    out = jax.block_until_ready(out)
    ref = _reference(batch, cluster_centers, alpha=alpha)
    assert out.shape == (N, K)
    assert jnp.allclose(out, ref, atol=2e-5, rtol=1e-4), "mismatch vs reference (case 1)"
    assert jnp.allclose(jnp.sum(out, axis=1), 1.0, atol=1e-5), "rows must sum to 1"

    # Case 2: ragged N (exercises wrapper padding) + alpha != 1 (exercises pow path).
    N2, alpha2 = 13, 2.0
    batch2 = jax.random.normal(k_batch2, (N2, D), dtype=jnp.float32)
    out2 = cluster_assignment(batch2, cluster_centers, alpha=alpha2)
    out2 = jax.block_until_ready(out2)
    ref2 = _reference(batch2, cluster_centers, alpha=alpha2)
    assert out2.shape == (N2, K)
    assert jnp.allclose(out2, ref2, atol=2e-5, rtol=1e-4), "mismatch vs reference (case 2)"
    assert jnp.allclose(jnp.sum(out2, axis=1), 1.0, atol=1e-5), "rows must sum to 1"

    print("KERNEL_OK")
</pallas_src>

<mosaic_0001>
module attributes {stable_mosaic.version = 11 : i64} {
  func.func @_cluster_assign_kernel(%arg0: i32, %arg1: memref<16x32xf32, #tpu.memory_space<vmem>>, %arg2: memref<32x128xf32, #tpu.memory_space<vmem>>, %arg3: memref<1x128xf32, #tpu.memory_space<vmem>>, %arg4: memref<16x128xf32, #tpu.memory_space<vmem>>) attributes {dimension_semantics = [#tpu.dimension_semantics<parallel>], iteration_bounds = array<i64: 1>, scalar_prefetch = 0 : i64, scratch_operands = 0 : i64, tpu.core_type = #tpu.core_type<tc>, window_params = [{transform_indices = @transform_0, window_bounds = array<i64: 16, 32>}, {pipeline_mode = #tpu.pipeline_mode<synchronous>, transform_indices = @transform_1, window_bounds = array<i64: 32, 128>}, {pipeline_mode = #tpu.pipeline_mode<synchronous>, transform_indices = @transform_2, window_bounds = array<i64: 1, 128>}, {transform_indices = @transform_3, window_bounds = array<i64: 16, 128>}]} {
    %c0 = arith.constant 0 : index
    %c0_0 = arith.constant 0 : index
    %0 = vector.load %arg1[%c0, %c0_0] : memref<16x32xf32, #tpu.memory_space<vmem>>, vector<16x32xf32>
    %c0_1 = arith.constant 0 : index
    %c0_2 = arith.constant 0 : index
    %1 = vector.load %arg2[%c0_1, %c0_2] : memref<32x128xf32, #tpu.memory_space<vmem>>, vector<32x128xf32>
    %c0_3 = arith.constant 0 : index
    %c0_4 = arith.constant 0 : index
    %2 = vector.load %arg3[%c0_3, %c0_4] : memref<1x128xf32, #tpu.memory_space<vmem>>, vector<1x128xf32>
    %3 = arith.mulf %0, %0 : vector<16x32xf32>
    %cst = arith.constant dense<0.000000e+00> : vector<16xf32>
    %4 = vector.multi_reduction <add>, %3, %cst [1] : vector<16x32xf32> to vector<16xf32>
    %5 = vector.shape_cast %4 : vector<16xf32> to vector<16x1xf32>
    %cst_5 = arith.constant dense<0.000000e+00> : vector<16x128xf32>
    %6 = tpu.matmul %0, %1, %cst_5 {dimension_numbers = #tpu.dot_dimension_numbers<[1], [0], [0], [1], [0, 0, 1, 1], [], []>} : vector<16x32xf32>, vector<32x128xf32>, vector<16x128xf32> -> vector<16x128xf32>
    %7 = vector.broadcast %5 : vector<16x1xf32> to vector<16x128xf32>
    %8 = vector.broadcast %2 : vector<1x128xf32> to vector<16x128xf32>
    %9 = arith.addf %7, %8 : vector<16x128xf32>
    %cst_6 = arith.constant 2.000000e+00 : f32
    %10 = vector.broadcast %cst_6 : f32 to vector<16x128xf32>
    %11 = arith.mulf %10, %6 : vector<16x128xf32>
    %12 = arith.subf %9, %11 : vector<16x128xf32>
    %cst_7 = arith.constant 0.000000e+00 : f32
    %13 = vector.broadcast %cst_7 : f32 to vector<16x128xf32>
    %14 = arith.maximumf %12, %13 : vector<16x128xf32>
    %cst_8 = arith.constant 1.000000e+00 : f32
    %15 = vector.broadcast %cst_8 : f32 to vector<16x128xf32>
    %16 = arith.mulf %14, %15 : vector<16x128xf32>
    %cst_9 = arith.constant 1.000000e+00 : f32
    %17 = vector.broadcast %cst_9 : f32 to vector<16x128xf32>
    %18 = arith.addf %17, %16 : vector<16x128xf32>
    %cst_10 = arith.constant 1.000000e+00 : f32
    %19 = vector.broadcast %cst_10 : f32 to vector<16x128xf32>
    %20 = arith.divf %19, %18 : vector<16x128xf32>
    %21 = tpu.iota {dimensions = array<i32: 1>} : vector<16x128xi32>
    %c4_i32 = arith.constant 4 : i32
    %22 = vector.broadcast %c4_i32 : i32 to vector<16x128xi32>
    %23 = arith.cmpi slt, %21, %22 : vector<16x128xi32>
    %cst_11 = arith.constant 0.000000e+00 : f32
    %24 = vector.broadcast %cst_11 : f32 to vector<16x128xf32>
    %25 = arith.select %23, %20, %24 : vector<16x128xi1>, vector<16x128xf32>
    %cst_12 = arith.constant dense<0.000000e+00> : vector<16xf32>
    %26 = vector.multi_reduction <add>, %25, %cst_12 [1] : vector<16x128xf32> to vector<16xf32>
    %27 = vector.shape_cast %26 : vector<16xf32> to vector<16x1xf32>
    %28 = tpu.reciprocal %27 : vector<16x1xf32> -> vector<16x1xf32>
    %29 = vector.broadcast %28 : vector<16x1xf32> to vector<16x128xf32>
    %30 = arith.mulf %25, %29 : vector<16x128xf32>
    %c0_13 = arith.constant 0 : index
    %c0_14 = arith.constant 0 : index
    %31 = vector.load %arg4[%c0_13, %c0_14] : memref<16x128xf32, #tpu.memory_space<vmem>>, vector<16x128xf32>
    tpu.vector_store %arg4[%c0_13, %c0_14], %30 {strides = array<i32>} : memref<16x128xf32, #tpu.memory_space<vmem>>, vector<16x128xf32>,
    return
  }
  func.func @transform_0(%arg0: i32) -> (i32, i32) {
    %c0_i32 = arith.constant 0 : i32
    %c0_i32_0 = arith.constant 0 : i32
    return %arg0, %c0_i32 : i32, i32
  }
  func.func @transform_1(%arg0: i32) -> (i32, i32) {
    %c0_i32 = arith.constant 0 : i32
    %c0_i32_0 = arith.constant 0 : i32
    %c0_i32_1 = arith.constant 0 : i32
    return %c0_i32, %c0_i32_0 : i32, i32
  }
  func.func @transform_2(%arg0: i32) -> (i32, i32) {
    %c0_i32 = arith.constant 0 : i32
    %c0_i32_0 = arith.constant 0 : i32
    %c0_i32_1 = arith.constant 0 : i32
    return %c0_i32, %c0_i32_0 : i32, i32
  }
  func.func @transform_3(%arg0: i32) -> (i32, i32) {
    %c0_i32 = arith.constant 0 : i32
    %c0_i32_0 = arith.constant 0 : i32
    return %arg0, %c0_i32 : i32, i32
  }
}

</mosaic_0001>

<bundles_post_ra>
// kernel: tpu_custom_call.1
= control target key start
LH: loop header
LB: loop body
LE: loop exit
PB: predicated region body
PF: predicated region fallthrough
CT: control target
= control target key end

     0   :  { %8 = vsyncpa [#allocation3], 0  ;;  %s342_s0 = inlined_call_operand.hbm [shape: f32[16,32], index: 0, kind: input, shape index: {}]   ;;  %s343_s1 = inlined_call_operand.hbm [shape: f32[32,128], index: 1, kind: input, shape index: {}]   ;;  %s344_s2 = inlined_call_operand.vmem [shape: f32[1,128], index: 2, kind: input, shape index: {}]   ;;  %s345_s3 = inlined_call_operand.hbm [shape: f32[16,128], index: 3, kind: output, shape index: {}]  }
   0x1   :  { %9 = vsyncpa [#allocation6], 0 }
   0x2   :  { %10 = vsyncpa [#allocation4], 0  ;;  %s292_s12 = smov [#allocation2]  }
   0x3   :  { %s16_s13 = sshll.u32 %s292_s12, 4  ;;  %s17_s13 = int_to_ptr.vmem [resolvable:$true] %s16_s13 }
   0x4   :  { %s234_s14 = scalar_lea.vmem %s17_s13, 256  ;;  %p239_p1 = scmp.lt.s32.totalorder %s17_s13, %s17_s13 }
   0x5   :  { %p235_p0 = scmp.ne.s32.totalorder %s17_s13, %s234_s14  ;;  %p240_p2 = scmp.lt.s32.totalorder %s234_s14, %s234_s14 }
   0x7   :  { %p241_p3 = por %p240_p2, %p239_p1 }
   0x9   :  { %p242_p4 = pnand %p241_p3, %p235_p0 }
   0xb   :  { %245 = shalt.err (!%p242_p4)
}
   0xc   :  { %s293_s15 = smov 128   ;;  %s294_s16 = smov 8  }
   0xd   :  { %22 = dma.hbm_to_vmem [thread:$0]  %s342_s0, 256, %s17_s13, [#allocation3], %s293_s15, %s293_s15, %s294_s16  }
   0xe   :  { %s295_s19 = smov [#allocation5]  }
   0xf   :  { %s28_s20 = sshll.u32 %s295_s19, 4  ;;  %s29_s20 = int_to_ptr.vmem [resolvable:$true] %s28_s20 }
  0x10   :  { %s254_s21 = scalar_lea.vmem %s29_s20, 512  ;;  %p259_p6 = scmp.lt.s32.totalorder %s29_s20, %s29_s20 }
  0x11   :  { %p255_p5 = scmp.ne.s32.totalorder %s29_s20, %s254_s21  ;;  %p260_p7 = scmp.lt.s32.totalorder %s254_s21, %s254_s21 }
  0x13   :  { %p261_p8 = por %p260_p7, %p259_p6 }
  0x15   :  { %p262_p9 = pnand %p261_p8, %p255_p5 }
  0x17   :  { %265 = shalt.err (!%p262_p9)
}
  0x18   :  { %34 = dma.hbm_to_vmem [thread:$0]  %s343_s1, 512, %s29_s20, [#allocation6], %s293_s15, %s293_s15, %s294_s16  }
  0x19   :  { %286 = dma.done.wait [#allocation3], 256  }
  0x1a   :  { %287 = vsyncadd [#allocation3], 4294967040 }
  0x1b   :  { %288 = dma.done.wait [#allocation6], 512  }
  0x1c   :  { %289 = vsyncadd [#allocation6], 4294966784  ;;  %vm52_vm0 = vcmask 261120   ;;  %v48_v0 = vld [vmem:[#allocation5 + $0x18] sm:$0xff]  ;;  %v47_v1 = vld [vmem:[#allocation5 + $0x10] sm:$0xff]  ;;  %v160_v25 = vlaneseq }
  0x1d   :  { %202 = vmatprep.subr.mxu0 %v48_v0  ;;  %v43_v2 = vld [vmem:[#allocation2] sm:$0xff]  ;;  %v44_v3 = vld [vmem:[#allocation2 + $0x8] sm:$0xff]  ;;  %v46_v4 = vld [vmem:[#allocation5 + $0x8] sm:$0xff] }
  0x1e   :  { %203 = vmatpush3.msra.mxu0 %v48_v0  ;;  %v50_v5 = vmul.f32 %v43_v2, %v43_v2  ;;  %210 = vmatprep.mubr.msk.f32.mxu0 %vm52_vm0, %v43_v2  ;;  %v51_v6 = vmul.f32 %v44_v3, %v44_v3  ;;  %v45_v7 = vld [vmem:[#allocation5] sm:$0xff]  ;;  %v195_v11 = vld [vmem:[%s344_s2] ss:$0 sm:$0xff]  ;;  %v161_v26 = vand.u32 127, %v160_v25  ;;  %s296_s2 = smov [#allocation7]  }
  0x1f   :  { %204 = vmatprep.subr.mxu0 %v47_v1  ;;  %s180_s24 = sshll.u32 %s296_s2, 4  ;;  %s181_s24 = int_to_ptr.vmem [resolvable:$true] %s180_s24 }
  0x20   :  { %205 = vmatpush3.msra.mxu0 %v47_v1  ;;  %v53_v8 = vsel %vm52_vm0, %v50_v5, 0.0  ;;  %v56_v9 = vsel %vm52_vm0, %v51_v6, 0.0  ;;  %vm162_vm1 = vcmp.lt.s32.totalorder %v161_v26, 4  ;;  %s266_s25 = scalar_lea.vmem %s181_s24, 256  ;;  %p271_p11 = scmp.lt.s32.totalorder %s181_s24, %s181_s24 }
  0x21   :  { %206 = vmatprep.subr.mxu0 %v46_v4  ;;  %54 = vadd.xlane.f32.xlu0 %v53_v8  ;;  %p267_p10 = scmp.ne.s32.totalorder %s181_s24, %s266_s25  ;;  %p272_p12 = scmp.lt.s32.totalorder %s266_s25, %s266_s25 }
  0x22   :  { %207 = vmatpush3.msra.mxu0 %v46_v4 }
  0x23   :  { %208 = vmatprep.subr.mxu0 %v45_v7  ;;  %p273_p13 = por %p272_p12, %p271_p11 }
  0x24   :  { %209 = vmatpush3.msra.mxu0 %v45_v7 }
  0x25   :  { %211 = vmatmul.mubr.msk.f32.vlgmr.msra.gmra.mxu0 %vm52_vm0, %v44_v3  ;;  %57 = vadd.xlane.f32.xlu0 %v56_v9  ;;  %p274_p0 = pnand %p273_p13, %p267_p10 }
  0xaa   :  { %v55_v10 = vpop.xlane.xlu0 %54 }
  0xab   :  { %v146_v15 = vadd.f32 %v195_v11, %v55_v10 }
  0xae   :  { %v58_v12 = vpop.xlane.xlu0 %57 }
  0xaf   :  { %v147_v13 = vadd.f32 %v195_v11, %v58_v12 }
  0xe5   :  { %v212_v14 = vpop.f32.mrf.mxu0 }
  0xe6   :  { %v149_v16 = vmul.f32 2.0, %v212_v14 }
  0xe7   :  { %v131_v17 = vpop.f32.mrf.mxu0 }
  0xe8   :  { %v151_v18 = vsub.f32 %v147_v13, %v149_v16  ;;  %v148_v19 = vmul.f32 2.0, %v131_v17 }
  0xea   :  { %v153_v20 = vmax.f32 %v151_v18, 0.0  ;;  %v150_v21 = vsub.f32 %v146_v15, %v148_v19 }
  0xec   :  { %v152_v22 = vmax.f32 %v150_v21, 0.0  ;;  %v155_v23 = vadd.f32 1.0, %v153_v20 }
  0xee   :  { %v154_v24 = vadd.f32 1.0, %v152_v22 }
  0xf0   :  { %218 = vrcp.f32 %v154_v24 }
  0xf1   :  { %220 = vrcp.f32 %v155_v23 }
  0xfd   :  { %v219_v27 = vpop.eup %218 }
  0xfe   :  { %v163_v28 = vsel %vm162_vm1, %v219_v27, 0.0  ;;  %v221_v29 = vpop.eup %220 }
  0xff   :  { %165 = vadd.xlane.f32.xlu1 %v163_v28  ;;  %v164_v30 = vsel %vm162_vm1, %v221_v29, 0.0 }
 0x103   :  { %167 = vadd.xlane.f32.xlu1 %v164_v30 }
 0x188   :  { %v166_v31 = vpop.xlane.xlu1 %165 }
 0x189   :  { %222 = vrcp.f32 %v166_v31 }
 0x18c   :  { %v168_v32 = vpop.xlane.xlu1 %167 }
 0x18d   :  { %224 = vrcp.f32 %v168_v32 }
 0x196   :  { %v223_v33 = vpop.eup %222 }
 0x197   :  { %v171_v34 = vmul.f32 %v223_v33, %v163_v28 }
 0x199   :  { %173 = vst [vmem:[#allocation7] sm:$0xff] %v171_v34 }
 0x19a   :  { %v225_v35 = vpop.eup %224 }
 0x19b   :  { %v172_v36 = vmul.f32 %v225_v35, %v164_v30 }
 0x19d   :  { %174 = vst [vmem:[#allocation7 + $0x8] sm:$0xff] %v172_v36 }
 0x19e   :  { %277 = shalt.err (!%p274_p0)
}
 0x19f   :  { %186 = dma.vmem_to_hbm [thread:$0]  %s181_s24, 256, %s345_s3, [#allocation4], %s293_s15, %s293_s15, %s294_s16  }
 0x1a0   :  { %290 = dma.done.wait [#allocation4], 256  }
 0x1a1   :  { %291 = vsyncadd [#allocation4], 4294967040 }
 0x1a2   :  { %190 = vsyncpa [#allocation3], 1 }
 0x1a3   :  { %191 = vsyncpa [#allocation6], 1 }
 0x1a4   :  { %192 = vsyncpa [#allocation4], 1 }

</bundles_post_ra>
